<compile_context>
chip_gen: v6e
topology: v6e:2x2x1
jax: 0.10.0
libtpu: 0.0.40
codegen_flags: <defaults>
</compile_context>

<pallas_src>
import functools

import jax
import jax.numpy as jnp
import numpy as np
from jax.experimental import pallas as pl
from jax.experimental.pallas import tpu as pltpu


def _plain_block_kernel(x_ref, wb1_ref, wb2_ref, pm_ref, g1_ref, b1_ref,
                        g2_ref, b2_ref, out_ref, *, N, H, W, Cin, Cmid, d, eps):
    """PlainBlock forward, all lane-dense (rows = H positions, lanes = W*C).

    x_ref  : (N, H + 4d, W*Cin)  f32, input padded by 2d zero rows top/bottom
    wb*_ref: (3, W*Cin_l, W*Cmid) bf16 banded conv weights (one slab per kernel row)
    pm_ref : (W*Cmid, W*Cmid)    f32, channel-averaging matrix (includes 1/(N*H*W))
    g*/b*  : (1, W*Cmid)         f32, BN gamma/beta pre-tiled to lane layout
    out_ref: (N, H, W*Cmid)      f32
    """
    Hp = H + 2 * d          # conv1 output grid: valid H rows + d halo rows for conv2
    WCo = W * Cmid

    # Halo-row mask on conv1's padded output grid (rows [d, H+d) are the real ones).
    row = jax.lax.broadcasted_iota(jnp.int32, (Hp, WCo), 0)
    valid = (row >= d) & (row < H + d)

    wb1 = wb1_ref[...]
    wb2 = wb2_ref[...]
    pm = pm_ref[...]

    # ---- pass 1: conv1 (banded matmuls) + single-pass BN1 stat accumulation ----
    y1_blocks = []
    s1 = jnp.zeros((1, WCo), jnp.float32)
    q1 = jnp.zeros((1, WCo), jnp.float32)
    for n in range(N):
        xin = x_ref[n]                                    # (H + 4d, W*Cin)
        acc = jnp.zeros((Hp, WCo), jnp.float32)
        for dy in range(3):
            slab = xin[dy * d:dy * d + Hp, :].astype(jnp.bfloat16)
            acc = acc + jnp.dot(slab, wb1[dy],
                                preferred_element_type=jnp.float32)
        acc = jnp.where(valid, acc, 0.0)                  # zero the halo rows
        s1 = s1 + jnp.sum(acc, axis=0, keepdims=True)
        q1 = q1 + jnp.sum(acc * acc, axis=0, keepdims=True)
        y1_blocks.append(acc)

    # BN1: fold batch stats into per-lane scale/shift (all f32).
    mean1 = jnp.dot(s1, pm, preferred_element_type=jnp.float32)
    ex21 = jnp.dot(q1, pm, preferred_element_type=jnp.float32)
    var1 = ex21 - mean1 * mean1
    a1 = g1_ref[...] * jax.lax.rsqrt(var1 + eps)
    c1 = b1_ref[...] - mean1 * a1

    # ---- pass 2: BN1+ReLU, conv2, accumulate BN2 stats ----
    y2_blocks = []
    s2 = jnp.zeros((1, WCo), jnp.float32)
    q2 = jnp.zeros((1, WCo), jnp.float32)
    for n in range(N):
        y1n = jnp.where(valid, jnp.maximum(y1_blocks[n] * a1 + c1, 0.0), 0.0)
        acc = jnp.zeros((H, WCo), jnp.float32)
        for dy in range(3):
            slab = y1n[dy * d:dy * d + H, :].astype(jnp.bfloat16)
            acc = acc + jnp.dot(slab, wb2[dy],
                                preferred_element_type=jnp.float32)
        s2 = s2 + jnp.sum(acc, axis=0, keepdims=True)
        q2 = q2 + jnp.sum(acc * acc, axis=0, keepdims=True)
        y2_blocks.append(acc)

    mean2 = jnp.dot(s2, pm, preferred_element_type=jnp.float32)
    ex22 = jnp.dot(q2, pm, preferred_element_type=jnp.float32)
    var2 = ex22 - mean2 * mean2
    a2 = g2_ref[...] * jax.lax.rsqrt(var2 + eps)
    c2 = b2_ref[...] - mean2 * a2

    # ---- BN2 + ReLU and fully lane-dense stores ----
    for n in range(N):
        out_ref[n, :, :] = jnp.maximum(y2_blocks[n] * a2 + c2, 0.0)


@functools.partial(jax.jit, static_argnames=("stride", "dilation"))
def plain_block_forward(x_nchw, params, *, stride=1, dilation=1):
    """Pallas-backed PlainBlock forward. Input/output are NCHW float32."""
    assert stride == 1, "only stride=1 is implemented"  # TODO(synk): stride > 1
    N, Cin, H, W = x_nchw.shape
    Cmid = params["w1"].shape[0]
    d = dilation

    # NCHW -> (N, H, W*Cin) with 2d zero rows of H-halo (wrapper glue; the W
    # padding is folded into the banded weights, so no W padding is needed).
    x_nhwc = jnp.transpose(x_nchw, (0, 2, 3, 1)).astype(jnp.float32)
    x_rows = x_nhwc.reshape(N, H, W * Cin)
    x_pad = jnp.pad(x_rows, ((0, 0), (2 * d, 2 * d), (0, 0)))

    # Banded weights: Wb[dy, w_in*Cin + ci, w_out*Cmid + co] = w[co, ci, dy, dx]
    # for w_in = w_out + (dx-1)*d when 0 <= w_in < W (out-of-range taps dropped
    # == zero padding along W).
    sel = np.zeros((3, W, W), np.float32)
    for dx in range(3):
        for w_out in range(W):
            w_in = w_out + (dx - 1) * d
            if 0 <= w_in < W:
                sel[dx, w_in, w_out] = 1.0
    sel = jnp.asarray(sel)

    def banded(w_oihw, cin):
        w_hwio = jnp.transpose(w_oihw, (2, 3, 1, 0)).astype(jnp.float32)  # (3,3,cin,Cmid)
        wb = jnp.einsum("xab,dxce->dacbe", sel, w_hwio)                    # (3,W,cin,W,Cmid)
        return wb.reshape(3, W * cin, W * Cmid).astype(jnp.bfloat16)

    wb1 = banded(params["w1"], Cin)
    wb2 = banded(params["w2"], Cmid)

    # Channel-averaging matrix: (row_sum @ pm)[lane] = mean of that lane's channel.
    M = N * H * W
    pm = jnp.asarray(np.tile(np.eye(Cmid, dtype=np.float32), (W, W)) / float(M))

    def lane(v):  # per-channel (Cmid,) vector -> per-(w,c) lane vector (1, W*Cmid)
        return jnp.tile(v.astype(jnp.float32).reshape(1, Cmid), (1, W))

    g1, b1 = lane(params["g1"]), lane(params["b1"])
    g2, b2 = lane(params["g2"]), lane(params["b2"])

    kernel = functools.partial(
        _plain_block_kernel,
        N=N, H=H, W=W, Cin=Cin, Cmid=Cmid, d=d, eps=1e-5)

    vmem = pl.BlockSpec(memory_space=pltpu.MemorySpace.VMEM)
    out = pl.pallas_call(
        kernel,
        out_shape=jax.ShapeDtypeStruct((N, H, W * Cmid), jnp.float32),
        in_specs=[vmem] * 8,
        out_specs=vmem,
    )(x_pad, wb1, wb2, pm, g1, b1, g2, b2)

    out_nhwc = out.reshape(N, H, W, Cmid)
    return jnp.transpose(out_nhwc, (0, 3, 1, 2))


def plain_block_reference(x_nchw, params, *, dilation=1):
    """Pure-JAX reference (XLA convs, f32) for correctness checking."""
    def conv(x, w):
        return jax.lax.conv_general_dilated(
            x, w, window_strides=(1, 1),
            padding=[(dilation, dilation), (dilation, dilation)],
            rhs_dilation=(dilation, dilation),
            dimension_numbers=("NCHW", "OIHW", "NCHW"))

    def bn_relu(x, g, b):
        mean = x.mean(axis=(0, 2, 3), keepdims=True)
        var = ((x - mean) ** 2).mean(axis=(0, 2, 3), keepdims=True)
        y = (x - mean) / jnp.sqrt(var + 1e-5)
        y = y * g.reshape(1, -1, 1, 1) + b.reshape(1, -1, 1, 1)
        return jax.nn.relu(y)

    x = bn_relu(conv(x_nchw, params["w1"]), params["g1"], params["b1"])
    x = bn_relu(conv(x, params["w2"]), params["g2"], params["b2"])
    return x


if __name__ == "__main__":
    # PlainBlock(in_channels=4, base_channels=8, stride=1, dilation=1),
    # x is NCHW = (2, 4, 16, 16).  Note W * Cmid = 128 -> lane-dense rows.
    N, Cin, H, W = 2, 4, 16, 16
    Cmid = 8

    key = jax.random.PRNGKey(0)
    k_x, k_w1, k_w2, k_g1, k_b1, k_g2, k_b2 = jax.random.split(key, 7)

    x = jax.random.normal(k_x, (N, Cin, H, W), jnp.float32)
    params = {
        "w1": 0.1 * jax.random.normal(k_w1, (Cmid, Cin, 3, 3), jnp.float32),
        "w2": 0.1 * jax.random.normal(k_w2, (Cmid, Cmid, 3, 3), jnp.float32),
        "g1": 1.0 + 0.1 * jax.random.normal(k_g1, (Cmid,), jnp.float32),
        "b1": 0.1 * jax.random.normal(k_b1, (Cmid,), jnp.float32),
        "g2": 1.0 + 0.1 * jax.random.normal(k_g2, (Cmid,), jnp.float32),
        "b2": 0.1 * jax.random.normal(k_b2, (Cmid,), jnp.float32),
    }

    out = plain_block_forward(x, params, stride=1, dilation=1)
    out = jax.block_until_ready(out)

    ref = jax.block_until_ready(plain_block_reference(x, params, dilation=1))
    assert out.shape == (N, Cmid, H, W), out.shape
    # Tolerance relaxed vs. pure-f32 because conv matmul operands are bf16
    # (BN statistics and normalization remain f32).
    np.testing.assert_allclose(np.asarray(out), np.asarray(ref),
                               rtol=2e-2, atol=2e-2)

    print("KERNEL_OK")
</pallas_src>

<mosaic_0001>
module attributes {stable_mosaic.version = 11 : i64} {
  func.func @_plain_block_kernel(%arg0: memref<2x20x64xf32, #tpu.memory_space<vmem>>, %arg1: memref<3x64x128xbf16, #tpu.memory_space<vmem>>, %arg2: memref<3x128x128xbf16, #tpu.memory_space<vmem>>, %arg3: memref<128x128xf32, #tpu.memory_space<vmem>>, %arg4: memref<1x128xf32, #tpu.memory_space<vmem>>, %arg5: memref<1x128xf32, #tpu.memory_space<vmem>>, %arg6: memref<1x128xf32, #tpu.memory_space<vmem>>, %arg7: memref<1x128xf32, #tpu.memory_space<vmem>>, %arg8: memref<2x16x128xf32, #tpu.memory_space<vmem>>) attributes {dimension_semantics = [], scalar_prefetch = 0 : i64, scratch_operands = 0 : i64, tpu.core_type = #tpu.core_type<tc>} {
    %0 = tpu.iota {dimensions = array<i32: 0>} : vector<18x128xi32>
    %c1_i32 = arith.constant 1 : i32
    %1 = vector.broadcast %c1_i32 : i32 to vector<18x128xi32>
    %2 = arith.cmpi sge, %0, %1 : vector<18x128xi32>
    %c17_i32 = arith.constant 17 : i32
    %3 = vector.broadcast %c17_i32 : i32 to vector<18x128xi32>
    %4 = arith.cmpi slt, %0, %3 : vector<18x128xi32>
    %5 = arith.andi %2, %4 : vector<18x128xi1>
    %c0 = arith.constant 0 : index
    %c0_0 = arith.constant 0 : index
    %c0_1 = arith.constant 0 : index
    %6 = vector.load %arg1[%c0, %c0_0, %c0_1] : memref<3x64x128xbf16, #tpu.memory_space<vmem>>, vector<3x64x128xbf16>
    %c0_2 = arith.constant 0 : index
    %c0_3 = arith.constant 0 : index
    %c0_4 = arith.constant 0 : index
    %7 = vector.load %arg2[%c0_2, %c0_3, %c0_4] : memref<3x128x128xbf16, #tpu.memory_space<vmem>>, vector<3x128x128xbf16>
    %c0_5 = arith.constant 0 : index
    %c0_6 = arith.constant 0 : index
    %8 = vector.load %arg3[%c0_5, %c0_6] : memref<128x128xf32, #tpu.memory_space<vmem>>, vector<128x128xf32>
    %cst = arith.constant 0.000000e+00 : f32
    %9 = vector.broadcast %cst : f32 to vector<1x128xf32>
    %cst_7 = arith.constant 0.000000e+00 : f32
    %10 = vector.broadcast %cst_7 : f32 to vector<1x128xf32>
    %c0_8 = arith.constant 0 : index
    %c0_9 = arith.constant 0 : index
    %c0_10 = arith.constant 0 : index
    %11 = vector.load %arg0[%c0_8, %c0_9, %c0_10] : memref<2x20x64xf32, #tpu.memory_space<vmem>>, vector<1x20x64xf32>
    %12 = vector.shape_cast %11 : vector<1x20x64xf32> to vector<20x64xf32>
    %cst_11 = arith.constant 0.000000e+00 : f32
    %13 = vector.broadcast %cst_11 : f32 to vector<18x128xf32>
    %14 = vector.extract_strided_slice %12 {offsets = [0, 0], sizes = [18, 64], strides = [1, 1]} : vector<20x64xf32> to vector<18x64xf32>
    %15 = arith.truncf %14 : vector<18x64xf32> to vector<18x64xbf16>
    %16 = vector.extract_strided_slice %6 {offsets = [0, 0, 0], sizes = [1, 64, 128], strides = [1, 1, 1]} : vector<3x64x128xbf16> to vector<1x64x128xbf16>
    %17 = vector.shape_cast %16 : vector<1x64x128xbf16> to vector<64x128xbf16>
    %cst_12 = arith.constant dense<0.000000e+00> : vector<18x128xf32>
    %18 = tpu.matmul %15, %17, %cst_12 {dimension_numbers = #tpu.dot_dimension_numbers<[1], [0], [0], [1], [0, 0, 1, 1], [], []>} : vector<18x64xbf16>, vector<64x128xbf16>, vector<18x128xf32> -> vector<18x128xf32>
    %19 = arith.addf %13, %18 : vector<18x128xf32>
    %20 = vector.extract_strided_slice %12 {offsets = [1, 0], sizes = [18, 64], strides = [1, 1]} : vector<20x64xf32> to vector<18x64xf32>
    %21 = arith.truncf %20 : vector<18x64xf32> to vector<18x64xbf16>
    %22 = vector.extract_strided_slice %6 {offsets = [1, 0, 0], sizes = [1, 64, 128], strides = [1, 1, 1]} : vector<3x64x128xbf16> to vector<1x64x128xbf16>
    %23 = vector.shape_cast %22 : vector<1x64x128xbf16> to vector<64x128xbf16>
    %cst_13 = arith.constant dense<0.000000e+00> : vector<18x128xf32>
    %24 = tpu.matmul %21, %23, %cst_13 {dimension_numbers = #tpu.dot_dimension_numbers<[1], [0], [0], [1], [0, 0, 1, 1], [], []>} : vector<18x64xbf16>, vector<64x128xbf16>, vector<18x128xf32> -> vector<18x128xf32>
    %25 = arith.addf %19, %24 : vector<18x128xf32>
    %26 = vector.extract_strided_slice %12 {offsets = [2, 0], sizes = [18, 64], strides = [1, 1]} : vector<20x64xf32> to vector<18x64xf32>
    %27 = arith.truncf %26 : vector<18x64xf32> to vector<18x64xbf16>
    %28 = vector.extract_strided_slice %6 {offsets = [2, 0, 0], sizes = [1, 64, 128], strides = [1, 1, 1]} : vector<3x64x128xbf16> to vector<1x64x128xbf16>
    %29 = vector.shape_cast %28 : vector<1x64x128xbf16> to vector<64x128xbf16>
    %cst_14 = arith.constant dense<0.000000e+00> : vector<18x128xf32>
    %30 = tpu.matmul %27, %29, %cst_14 {dimension_numbers = #tpu.dot_dimension_numbers<[1], [0], [0], [1], [0, 0, 1, 1], [], []>} : vector<18x64xbf16>, vector<64x128xbf16>, vector<18x128xf32> -> vector<18x128xf32>
    %31 = arith.addf %25, %30 : vector<18x128xf32>
    %cst_15 = arith.constant 0.000000e+00 : f32
    %32 = vector.broadcast %cst_15 : f32 to vector<18x128xf32>
    %33 = arith.select %5, %31, %32 : vector<18x128xi1>, vector<18x128xf32>
    %cst_16 = arith.constant dense<0.000000e+00> : vector<128xf32>
    %34 = vector.multi_reduction <add>, %33, %cst_16 [0] : vector<18x128xf32> to vector<128xf32>
    %35 = vector.shape_cast %34 : vector<128xf32> to vector<1x128xf32>
    %36 = arith.addf %9, %35 : vector<1x128xf32>
    %37 = arith.mulf %33, %33 : vector<18x128xf32>
    %cst_17 = arith.constant dense<0.000000e+00> : vector<128xf32>
    %38 = vector.multi_reduction <add>, %37, %cst_17 [0] : vector<18x128xf32> to vector<128xf32>
    %39 = vector.shape_cast %38 : vector<128xf32> to vector<1x128xf32>
    %40 = arith.addf %10, %39 : vector<1x128xf32>
    %c1 = arith.constant 1 : index
    %c0_18 = arith.constant 0 : index
    %c0_19 = arith.constant 0 : index
    %41 = vector.load %arg0[%c1, %c0_18, %c0_19] : memref<2x20x64xf32, #tpu.memory_space<vmem>>, vector<1x20x64xf32>
    %42 = vector.shape_cast %41 : vector<1x20x64xf32> to vector<20x64xf32>
    %cst_20 = arith.constant 0.000000e+00 : f32
    %43 = vector.broadcast %cst_20 : f32 to vector<18x128xf32>
    %44 = vector.extract_strided_slice %42 {offsets = [0, 0], sizes = [18, 64], strides = [1, 1]} : vector<20x64xf32> to vector<18x64xf32>
    %45 = arith.truncf %44 : vector<18x64xf32> to vector<18x64xbf16>
    %46 = vector.extract_strided_slice %6 {offsets = [0, 0, 0], sizes = [1, 64, 128], strides = [1, 1, 1]} : vector<3x64x128xbf16> to vector<1x64x128xbf16>
    %47 = vector.shape_cast %46 : vector<1x64x128xbf16> to vector<64x128xbf16>
    %cst_21 = arith.constant dense<0.000000e+00> : vector<18x128xf32>
    %48 = tpu.matmul %45, %47, %cst_21 {dimension_numbers = #tpu.dot_dimension_numbers<[1], [0], [0], [1], [0, 0, 1, 1], [], []>} : vector<18x64xbf16>, vector<64x128xbf16>, vector<18x128xf32> -> vector<18x128xf32>
    %49 = arith.addf %43, %48 : vector<18x128xf32>
    %50 = vector.extract_strided_slice %42 {offsets = [1, 0], sizes = [18, 64], strides = [1, 1]} : vector<20x64xf32> to vector<18x64xf32>
    %51 = arith.truncf %50 : vector<18x64xf32> to vector<18x64xbf16>
    %52 = vector.extract_strided_slice %6 {offsets = [1, 0, 0], sizes = [1, 64, 128], strides = [1, 1, 1]} : vector<3x64x128xbf16> to vector<1x64x128xbf16>
    %53 = vector.shape_cast %52 : vector<1x64x128xbf16> to vector<64x128xbf16>
    %cst_22 = arith.constant dense<0.000000e+00> : vector<18x128xf32>
    %54 = tpu.matmul %51, %53, %cst_22 {dimension_numbers = #tpu.dot_dimension_numbers<[1], [0], [0], [1], [0, 0, 1, 1], [], []>} : vector<18x64xbf16>, vector<64x128xbf16>, vector<18x128xf32> -> vector<18x128xf32>
    %55 = arith.addf %49, %54 : vector<18x128xf32>
    %56 = vector.extract_strided_slice %42 {offsets = [2, 0], sizes = [18, 64], strides = [1, 1]} : vector<20x64xf32> to vector<18x64xf32>
    %57 = arith.truncf %56 : vector<18x64xf32> to vector<18x64xbf16>
    %58 = vector.extract_strided_slice %6 {offsets = [2, 0, 0], sizes = [1, 64, 128], strides = [1, 1, 1]} : vector<3x64x128xbf16> to vector<1x64x128xbf16>
    %59 = vector.shape_cast %58 : vector<1x64x128xbf16> to vector<64x128xbf16>
    %cst_23 = arith.constant dense<0.000000e+00> : vector<18x128xf32>
    %60 = tpu.matmul %57, %59, %cst_23 {dimension_numbers = #tpu.dot_dimension_numbers<[1], [0], [0], [1], [0, 0, 1, 1], [], []>} : vector<18x64xbf16>, vector<64x128xbf16>, vector<18x128xf32> -> vector<18x128xf32>
    %61 = arith.addf %55, %60 : vector<18x128xf32>
    %cst_24 = arith.constant 0.000000e+00 : f32
    %62 = vector.broadcast %cst_24 : f32 to vector<18x128xf32>
    %63 = arith.select %5, %61, %62 : vector<18x128xi1>, vector<18x128xf32>
    %cst_25 = arith.constant dense<0.000000e+00> : vector<128xf32>
    %64 = vector.multi_reduction <add>, %63, %cst_25 [0] : vector<18x128xf32> to vector<128xf32>
    %65 = vector.shape_cast %64 : vector<128xf32> to vector<1x128xf32>
    %66 = arith.addf %36, %65 : vector<1x128xf32>
    %67 = arith.mulf %63, %63 : vector<18x128xf32>
    %cst_26 = arith.constant dense<0.000000e+00> : vector<128xf32>
    %68 = vector.multi_reduction <add>, %67, %cst_26 [0] : vector<18x128xf32> to vector<128xf32>
    %69 = vector.shape_cast %68 : vector<128xf32> to vector<1x128xf32>
    %70 = arith.addf %40, %69 : vector<1x128xf32>
    %cst_27 = arith.constant dense<0.000000e+00> : vector<1x128xf32>
    %71 = tpu.matmul %66, %8, %cst_27 {dimension_numbers = #tpu.dot_dimension_numbers<[1], [0], [0], [1], [0, 0, 1, 1], [], []>} : vector<1x128xf32>, vector<128x128xf32>, vector<1x128xf32> -> vector<1x128xf32>
    %cst_28 = arith.constant dense<0.000000e+00> : vector<1x128xf32>
    %72 = tpu.matmul %70, %8, %cst_28 {dimension_numbers = #tpu.dot_dimension_numbers<[1], [0], [0], [1], [0, 0, 1, 1], [], []>} : vector<1x128xf32>, vector<128x128xf32>, vector<1x128xf32> -> vector<1x128xf32>
    %73 = arith.mulf %71, %71 : vector<1x128xf32>
    %74 = arith.subf %72, %73 : vector<1x128xf32>
    %c0_29 = arith.constant 0 : index
    %c0_30 = arith.constant 0 : index
    %75 = vector.load %arg4[%c0_29, %c0_30] : memref<1x128xf32, #tpu.memory_space<vmem>>, vector<1x128xf32>
    %cst_31 = arith.constant 9.99999974E-6 : f32
    %76 = vector.broadcast %cst_31 : f32 to vector<1x128xf32>
    %77 = arith.addf %74, %76 : vector<1x128xf32>
    %78 = math.rsqrt %77 : vector<1x128xf32>
    %79 = arith.mulf %75, %78 : vector<1x128xf32>
    %c0_32 = arith.constant 0 : index
    %c0_33 = arith.constant 0 : index
    %80 = vector.load %arg5[%c0_32, %c0_33] : memref<1x128xf32, #tpu.memory_space<vmem>>, vector<1x128xf32>
    %81 = arith.mulf %71, %79 : vector<1x128xf32>
    %82 = arith.subf %80, %81 : vector<1x128xf32>
    %cst_34 = arith.constant 0.000000e+00 : f32
    %83 = vector.broadcast %cst_34 : f32 to vector<1x128xf32>
    %cst_35 = arith.constant 0.000000e+00 : f32
    %84 = vector.broadcast %cst_35 : f32 to vector<1x128xf32>
    %85 = vector.broadcast %79 : vector<1x128xf32> to vector<18x128xf32>
    %86 = arith.mulf %33, %85 : vector<18x128xf32>
    %87 = vector.broadcast %82 : vector<1x128xf32> to vector<18x128xf32>
    %88 = arith.addf %86, %87 : vector<18x128xf32>
    %cst_36 = arith.constant 0.000000e+00 : f32
    %89 = vector.broadcast %cst_36 : f32 to vector<18x128xf32>
    %90 = arith.maximumf %88, %89 : vector<18x128xf32>
    %cst_37 = arith.constant 0.000000e+00 : f32
    %91 = vector.broadcast %cst_37 : f32 to vector<18x128xf32>
    %92 = arith.select %5, %90, %91 : vector<18x128xi1>, vector<18x128xf32>
    %cst_38 = arith.constant 0.000000e+00 : f32
    %93 = vector.broadcast %cst_38 : f32 to vector<16x128xf32>
    %94 = vector.extract_strided_slice %92 {offsets = [0, 0], sizes = [16, 128], strides = [1, 1]} : vector<18x128xf32> to vector<16x128xf32>
    %95 = arith.truncf %94 : vector<16x128xf32> to vector<16x128xbf16>
    %96 = vector.extract_strided_slice %7 {offsets = [0, 0, 0], sizes = [1, 128, 128], strides = [1, 1, 1]} : vector<3x128x128xbf16> to vector<1x128x128xbf16>
    %97 = vector.shape_cast %96 : vector<1x128x128xbf16> to vector<128x128xbf16>
    %cst_39 = arith.constant dense<0.000000e+00> : vector<16x128xf32>
    %98 = tpu.matmul %95, %97, %cst_39 {dimension_numbers = #tpu.dot_dimension_numbers<[1], [0], [0], [1], [0, 0, 1, 1], [], []>} : vector<16x128xbf16>, vector<128x128xbf16>, vector<16x128xf32> -> vector<16x128xf32>
    %99 = arith.addf %93, %98 : vector<16x128xf32>
    %100 = vector.extract_strided_slice %92 {offsets = [1, 0], sizes = [16, 128], strides = [1, 1]} : vector<18x128xf32> to vector<16x128xf32>
    %101 = arith.truncf %100 : vector<16x128xf32> to vector<16x128xbf16>
    %102 = vector.extract_strided_slice %7 {offsets = [1, 0, 0], sizes = [1, 128, 128], strides = [1, 1, 1]} : vector<3x128x128xbf16> to vector<1x128x128xbf16>
    %103 = vector.shape_cast %102 : vector<1x128x128xbf16> to vector<128x128xbf16>
    %cst_40 = arith.constant dense<0.000000e+00> : vector<16x128xf32>
    %104 = tpu.matmul %101, %103, %cst_40 {dimension_numbers = #tpu.dot_dimension_numbers<[1], [0], [0], [1], [0, 0, 1, 1], [], []>} : vector<16x128xbf16>, vector<128x128xbf16>, vector<16x128xf32> -> vector<16x128xf32>
    %105 = arith.addf %99, %104 : vector<16x128xf32>
    %106 = vector.extract_strided_slice %92 {offsets = [2, 0], sizes = [16, 128], strides = [1, 1]} : vector<18x128xf32> to vector<16x128xf32>
    %107 = arith.truncf %106 : vector<16x128xf32> to vector<16x128xbf16>
    %108 = vector.extract_strided_slice %7 {offsets = [2, 0, 0], sizes = [1, 128, 128], strides = [1, 1, 1]} : vector<3x128x128xbf16> to vector<1x128x128xbf16>
    %109 = vector.shape_cast %108 : vector<1x128x128xbf16> to vector<128x128xbf16>
    %cst_41 = arith.constant dense<0.000000e+00> : vector<16x128xf32>
    %110 = tpu.matmul %107, %109, %cst_41 {dimension_numbers = #tpu.dot_dimension_numbers<[1], [0], [0], [1], [0, 0, 1, 1], [], []>} : vector<16x128xbf16>, vector<128x128xbf16>, vector<16x128xf32> -> vector<16x128xf32>
    %111 = arith.addf %105, %110 : vector<16x128xf32>
    %cst_42 = arith.constant dense<0.000000e+00> : vector<128xf32>
    %112 = vector.multi_reduction <add>, %111, %cst_42 [0] : vector<16x128xf32> to vector<128xf32>
    %113 = vector.shape_cast %112 : vector<128xf32> to vector<1x128xf32>
    %114 = arith.addf %83, %113 : vector<1x128xf32>
    %115 = arith.mulf %111, %111 : vector<16x128xf32>
    %cst_43 = arith.constant dense<0.000000e+00> : vector<128xf32>
    %116 = vector.multi_reduction <add>, %115, %cst_43 [0] : vector<16x128xf32> to vector<128xf32>
    %117 = vector.shape_cast %116 : vector<128xf32> to vector<1x128xf32>
    %118 = arith.addf %84, %117 : vector<1x128xf32>
    %119 = vector.broadcast %79 : vector<1x128xf32> to vector<18x128xf32>
    %120 = arith.mulf %63, %119 : vector<18x128xf32>
    %121 = vector.broadcast %82 : vector<1x128xf32> to vector<18x128xf32>
    %122 = arith.addf %120, %121 : vector<18x128xf32>
    %cst_44 = arith.constant 0.000000e+00 : f32
    %123 = vector.broadcast %cst_44 : f32 to vector<18x128xf32>
    %124 = arith.maximumf %122, %123 : vector<18x128xf32>
    %cst_45 = arith.constant 0.000000e+00 : f32
    %125 = vector.broadcast %cst_45 : f32 to vector<18x128xf32>
    %126 = arith.select %5, %124, %125 : vector<18x128xi1>, vector<18x128xf32>
    %cst_46 = arith.constant 0.000000e+00 : f32
    %127 = vector.broadcast %cst_46 : f32 to vector<16x128xf32>
    %128 = vector.extract_strided_slice %126 {offsets = [0, 0], sizes = [16, 128], strides = [1, 1]} : vector<18x128xf32> to vector<16x128xf32>
    %129 = arith.truncf %128 : vector<16x128xf32> to vector<16x128xbf16>
    %130 = vector.extract_strided_slice %7 {offsets = [0, 0, 0], sizes = [1, 128, 128], strides = [1, 1, 1]} : vector<3x128x128xbf16> to vector<1x128x128xbf16>
    %131 = vector.shape_cast %130 : vector<1x128x128xbf16> to vector<128x128xbf16>
    %cst_47 = arith.constant dense<0.000000e+00> : vector<16x128xf32>
    %132 = tpu.matmul %129, %131, %cst_47 {dimension_numbers = #tpu.dot_dimension_numbers<[1], [0], [0], [1], [0, 0, 1, 1], [], []>} : vector<16x128xbf16>, vector<128x128xbf16>, vector<16x128xf32> -> vector<16x128xf32>
    %133 = arith.addf %127, %132 : vector<16x128xf32>
    %134 = vector.extract_strided_slice %126 {offsets = [1, 0], sizes = [16, 128], strides = [1, 1]} : vector<18x128xf32> to vector<16x128xf32>
    %135 = arith.truncf %134 : vector<16x128xf32> to vector<16x128xbf16>
    %136 = vector.extract_strided_slice %7 {offsets = [1, 0, 0], sizes = [1, 128, 128], strides = [1, 1, 1]} : vector<3x128x128xbf16> to vector<1x128x128xbf16>
    %137 = vector.shape_cast %136 : vector<1x128x128xbf16> to vector<128x128xbf16>
    %cst_48 = arith.constant dense<0.000000e+00> : vector<16x128xf32>
    %138 = tpu.matmul %135, %137, %cst_48 {dimension_numbers = #tpu.dot_dimension_numbers<[1], [0], [0], [1], [0, 0, 1, 1], [], []>} : vector<16x128xbf16>, vector<128x128xbf16>, vector<16x128xf32> -> vector<16x128xf32>
    %139 = arith.addf %133, %138 : vector<16x128xf32>
    %140 = vector.extract_strided_slice %126 {offsets = [2, 0], sizes = [16, 128], strides = [1, 1]} : vector<18x128xf32> to vector<16x128xf32>
    %141 = arith.truncf %140 : vector<16x128xf32> to vector<16x128xbf16>
    %142 = vector.extract_strided_slice %7 {offsets = [2, 0, 0], sizes = [1, 128, 128], strides = [1, 1, 1]} : vector<3x128x128xbf16> to vector<1x128x128xbf16>
    %143 = vector.shape_cast %142 : vector<1x128x128xbf16> to vector<128x128xbf16>
    %cst_49 = arith.constant dense<0.000000e+00> : vector<16x128xf32>
    %144 = tpu.matmul %141, %143, %cst_49 {dimension_numbers = #tpu.dot_dimension_numbers<[1], [0], [0], [1], [0, 0, 1, 1], [], []>} : vector<16x128xbf16>, vector<128x128xbf16>, vector<16x128xf32> -> vector<16x128xf32>
    %145 = arith.addf %139, %144 : vector<16x128xf32>
    %cst_50 = arith.constant dense<0.000000e+00> : vector<128xf32>
    %146 = vector.multi_reduction <add>, %145, %cst_50 [0] : vector<16x128xf32> to vector<128xf32>
    %147 = vector.shape_cast %146 : vector<128xf32> to vector<1x128xf32>
    %148 = arith.addf %114, %147 : vector<1x128xf32>
    %149 = arith.mulf %145, %145 : vector<16x128xf32>
    %cst_51 = arith.constant dense<0.000000e+00> : vector<128xf32>
    %150 = vector.multi_reduction <add>, %149, %cst_51 [0] : vector<16x128xf32> to vector<128xf32>
    %151 = vector.shape_cast %150 : vector<128xf32> to vector<1x128xf32>
    %152 = arith.addf %118, %151 : vector<1x128xf32>
    %cst_52 = arith.constant dense<0.000000e+00> : vector<1x128xf32>
    %153 = tpu.matmul %148, %8, %cst_52 {dimension_numbers = #tpu.dot_dimension_numbers<[1], [0], [0], [1], [0, 0, 1, 1], [], []>} : vector<1x128xf32>, vector<128x128xf32>, vector<1x128xf32> -> vector<1x128xf32>
    %cst_53 = arith.constant dense<0.000000e+00> : vector<1x128xf32>
    %154 = tpu.matmul %152, %8, %cst_53 {dimension_numbers = #tpu.dot_dimension_numbers<[1], [0], [0], [1], [0, 0, 1, 1], [], []>} : vector<1x128xf32>, vector<128x128xf32>, vector<1x128xf32> -> vector<1x128xf32>
    %155 = arith.mulf %153, %153 : vector<1x128xf32>
    %156 = arith.subf %154, %155 : vector<1x128xf32>
    %c0_54 = arith.constant 0 : index
    %c0_55 = arith.constant 0 : index
    %157 = vector.load %arg6[%c0_54, %c0_55] : memref<1x128xf32, #tpu.memory_space<vmem>>, vector<1x128xf32>
    %cst_56 = arith.constant 9.99999974E-6 : f32
    %158 = vector.broadcast %cst_56 : f32 to vector<1x128xf32>
    %159 = arith.addf %156, %158 : vector<1x128xf32>
    %160 = math.rsqrt %159 : vector<1x128xf32>
    %161 = arith.mulf %157, %160 : vector<1x128xf32>
    %c0_57 = arith.constant 0 : index
    %c0_58 = arith.constant 0 : index
    %162 = vector.load %arg7[%c0_57, %c0_58] : memref<1x128xf32, #tpu.memory_space<vmem>>, vector<1x128xf32>
    %163 = arith.mulf %153, %161 : vector<1x128xf32>
    %164 = arith.subf %162, %163 : vector<1x128xf32>
    %165 = vector.broadcast %161 : vector<1x128xf32> to vector<16x128xf32>
    %166 = arith.mulf %111, %165 : vector<16x128xf32>
    %167 = vector.broadcast %164 : vector<1x128xf32> to vector<16x128xf32>
    %168 = arith.addf %166, %167 : vector<16x128xf32>
    %cst_59 = arith.constant 0.000000e+00 : f32
    %169 = vector.broadcast %cst_59 : f32 to vector<16x128xf32>
    %170 = arith.maximumf %168, %169 : vector<16x128xf32>
    %c0_60 = arith.constant 0 : index
    %c0_61 = arith.constant 0 : index
    %c0_62 = arith.constant 0 : index
    %171 = vector.load %arg8[%c0_60, %c0_61, %c0_62] : memref<2x16x128xf32, #tpu.memory_space<vmem>>, vector<1x16x128xf32>
    %172 = vector.shape_cast %171 : vector<1x16x128xf32> to vector<16x128xf32>
    %173 = vector.shape_cast %170 : vector<16x128xf32> to vector<1x16x128xf32>
    tpu.vector_store %arg8[%c0_60, %c0_61, %c0_62], %173 {strides = array<i32>} : memref<2x16x128xf32, #tpu.memory_space<vmem>>, vector<1x16x128xf32>,
    %174 = vector.broadcast %161 : vector<1x128xf32> to vector<16x128xf32>
    %175 = arith.mulf %145, %174 : vector<16x128xf32>
    %176 = vector.broadcast %164 : vector<1x128xf32> to vector<16x128xf32>
    %177 = arith.addf %175, %176 : vector<16x128xf32>
    %cst_63 = arith.constant 0.000000e+00 : f32
    %178 = vector.broadcast %cst_63 : f32 to vector<16x128xf32>
    %179 = arith.maximumf %177, %178 : vector<16x128xf32>
    %c1_64 = arith.constant 1 : index
    %c0_65 = arith.constant 0 : index
    %c0_66 = arith.constant 0 : index
    %180 = vector.load %arg8[%c1_64, %c0_65, %c0_66] : memref<2x16x128xf32, #tpu.memory_space<vmem>>, vector<1x16x128xf32>
    %181 = vector.shape_cast %180 : vector<1x16x128xf32> to vector<16x128xf32>
    %182 = vector.shape_cast %179 : vector<16x128xf32> to vector<1x16x128xf32>
    tpu.vector_store %arg8[%c1_64, %c0_65, %c0_66], %182 {strides = array<i32>} : memref<2x16x128xf32, #tpu.memory_space<vmem>>, vector<1x16x128xf32>,
    return
  }
}

</mosaic_0001>

<bundles_post_ra>
// kernel: plain_block_forward.1
= control target key start
LH: loop header
LB: loop body
LE: loop exit
PB: predicated region body
PF: predicated region fallthrough
CT: control target
= control target key end

     0   :  { %vm176_vm0 = vcmask 523264   ;;  %vm136_vm1 = vsmask.f32 7424  ;;  %vm309_vm2 = vcmask 1046528   ;;  %v2067_v46 = vmov 0.0   ;;  %s2797_s1 = inlined_call_operand.vmem [shape: bf16[3,64,128], index: 1, kind: input, shape index: {}]   ;;  %s2798_s0 = inlined_call_operand.vmem [shape: f32[2,20,64], index: 0, kind: input, shape index: {}]   ;;  %s2799_s3 = inlined_call_operand.vmem [shape: f32[128,128], index: 3, kind: input, shape index: {}]   ;;  %s2800_s2 = inlined_call_operand.vmem [shape: bf16[3,128,128], index: 2, kind: input, shape index: {}]   ;;  %s2801_s4 = inlined_call_operand.vmem [shape: f32[1,128], index: 4, kind: input, shape index: {}]   ;;  %s2802_s5 = inlined_call_operand.vmem [shape: f32[1,128], index: 5, kind: input, shape index: {}]   ;;  %s2803_s6 = inlined_call_operand.vmem [shape: f32[1,128], index: 6, kind: input, shape index: {}]   ;;  %s2804_s7 = inlined_call_operand.vmem [shape: f32[1,128], index: 7, kind: input, shape index: {}]   ;;  %s2805_s8 = inlined_call_operand.vmem [shape: f32[2,16,128], index: 8, kind: output, shape index: {}]  }
   0x1   :  { %v2027_v0 = vld [vmem:[%s2797_s1 + $0x38] sm:$0xff]   ;;  %v2126_v2 = vld [vmem:[%s2797_s1 + $0x30] sm:$0xff]   ;;  %v2139_v4 = vld [vmem:[%s2797_s1 + $0x28] sm:$0xff]   ;;  %vm2068_vm3 = vmmov 0   ;;  %vm398_vm6 = vcmask 1041408   ;;  %vm2069_vm7 = vmmov 1  }
   0x2   :  { %v2121_v1 = vld [vmem:[%s2797_s1 + $0x18] sm:$0xff]   ;;  %1692 = vmatprep.subr.bf16.mxu0 %v2027_v0  ;;  %v2132_v3 = vld [vmem:[%s2797_s1 + $0x10] sm:$0xff]   ;;  %v2145_v5 = vld [vmem:[%s2797_s1 + $0x8] sm:$0xff]  }
   0x3   :  { %1704 = vmatprep.subr.bf16.mxu1 %v2121_v1  ;;  %1693 = vmatpush3.bf16.msra.mxu0 %v2027_v0  ;;  %v2151_v6 = vld [vmem:[%s2797_s1 + $0x20] sm:$0xff]   ;;  %v132_v8 = vld [vmem:[%s2798_s0 + $0x8] sm:$0xff]  ;;  %v133_v9 = vld [vmem:[%s2798_s0 + $0x10] sm:$0xf] }
   0x4   :  { %1705 = vmatpush3.bf16.msra.mxu1 %v2121_v1  ;;  %1694 = vmatprep.subr.bf16.mxu0 %v2126_v2  ;;  %v131_v7 = vld [vmem:[%s2798_s0] sm:$0xff]  ;;  %v2170_v12 = vpack.c.bf16 %v133_v9, %v133_v9  ;;  %v2035_v17 = vld [vmem:[%s2797_s1 + $0x58] sm:$0xff]   ;;  %v1495_v23 = vld [vmem:[%s2798_s0 + $0x28] sm:$0xf] }
   0x5   :  { %1706 = vmatprep.subr.bf16.mxu1 %v2132_v3  ;;  %v2168_v10 = vld [vmem:[%s2797_s1] sm:$0xff]   ;;  %v134_v11 = vpack.c.bf16 %v132_v8, %v131_v7  ;;  %v1493_v21 = vld [vmem:[%s2798_s0 + $0x18] sm:$0xff]  ;;  %v426_v28 = vpack.c.bf16 %v1495_v23, %v1495_v23  ;;  %v2036_v30 = vld [vmem:[%s2797_s1 + $0x50] sm:$0xff]  }
   0x6   :  { %v145_v15 = vshll.u32 %v2170_v12, 16  ;;  %v149_v16 = vshrl.u32 %v2170_v12, 16  ;;  %v1494_v22 = vld [vmem:[%s2798_s0 + $0x20] sm:$0xff]  ;;  %v311_v26 = vrot.slane %v2170_v12, 1  ;;  %v2037_v37 = vld [vmem:[%s2797_s1 + $0x48] sm:$0xff]   ;;  %v2237_v47 = vld [vmem:[%s2799_s3 + $0x78] sm:$0xff] }
   0x7   :  { %1695 = vmatpush3.bf16.msra.mxu0 %v2126_v2  ;;  %v138_v13 = vshrl.u32 %v134_v11, 16  ;;  %v140_v14 = vshll.u32 %v134_v11, 16  ;;  %1712 = vmatprep.mubr.msk.bf16.mxu1 %vm176_vm0, %v134_v11  ;;  %v310_v20 = vrot.slane %v134_v11, 1  ;;  %v425_v27 = vpack.c.bf16 %v1494_v22, %v1493_v21  ;;  %v2038_v40 = vld [vmem:[%s2797_s1 + $0x40] sm:$0xff]   ;;  %v2246_v48 = vld [vmem:[%s2799_s3 + $0x70] sm:$0xff]  ;;  %v2255_v49 = vld [vmem:[%s2799_s3 + $0x68] sm:$0xff] }
   0x8   :  { %1707 = vmatpush3.bf16.msra.mxu1 %v2132_v3  ;;  %1696 = vmatprep.subr.bf16.mxu0 %v2139_v4  ;;  %v147_v19 = vrot.slane %v145_v15, 1  ;;  %v435_v33 = vshll.u32 %v426_v28, 16  ;;  %v439_v41 = vshrl.u32 %v426_v28, 16  ;;  %v551_v44 = vrot.slane %v426_v28, 1  ;;  %v2264_v50 = vld [vmem:[%s2799_s3 + $0x60] sm:$0xff]  ;;  %v2273_v51 = vld [vmem:[%s2799_s3 + $0x58] sm:$0xff] }
   0x9   :  { %1708 = vmatprep.subr.bf16.mxu1 %v2145_v5  ;;  %v142_v18 = vrot.slane %v140_v14, 1  ;;  %v428_v31 = vshrl.u32 %v425_v27, 16  ;;  %v430_v32 = vshll.u32 %v425_v27, 16  ;;  %v312_v34 = vsel %vm309_vm2, %v310_v20, %v311_v26  ;;  %v2282_v52 = vld [vmem:[%s2799_s3 + $0x50] sm:$0xff]  ;;  %v2291_v53 = vld [vmem:[%s2799_s3 + $0x48] sm:$0xff]  ;;  %v2300_v54 = vld [vmem:[%s2799_s3 + $0x40] sm:$0xff] }
   0xa   :  { %v151_v25 = vor.u32 %v149_v16, %v147_v19  ;;  %v437_v36 = vrot.slane %v435_v33, 1  ;;  %v550_v43 = vrot.slane %v425_v27, 1  ;;  %v2309_v55 = vld [vmem:[%s2799_s3 + $0x38] sm:$0xff]  ;;  %v2318_v56 = vld [vmem:[%s2799_s3 + $0x30] sm:$0xff]  ;;  %v2327_v57 = vld [vmem:[%s2799_s3 + $0x28] sm:$0xff] }
   0xb   :  { %1697 = vmatpush3.bf16.msra.mxu0 %v2139_v4  ;;  %v143_v24 = vor.u32 %v142_v18, %v138_v13  ;;  %v432_v35 = vrot.slane %v430_v32, 1  ;;  %v2336_v58 = vld [vmem:[%s2799_s3 + $0x20] sm:$0xff]  ;;  %v2345_v59 = vld [vmem:[%s2799_s3 + $0x18] sm:$0xff]  ;;  %v2351_v60 = vld [vmem:[%s2799_s3 + $0x10] sm:$0xff] }
   0xc   :  { %1709 = vmatpush3.bf16.msra.mxu1 %v2145_v5  ;;  %1698 = vmatprep.subr.bf16.mxu0 %v2151_v6  ;;  %v441_v42 = vor.u32 %v439_v41, %v437_v36  ;;  %v552_v45 = vsel %vm309_vm2, %v550_v43, %v551_v44  ;;  %v2360_v61 = vld [vmem:[%s2799_s3 + $0x8] sm:$0xff]  ;;  %v2369_v62 = vld [vmem:[%s2799_s3] sm:$0xff] }
   0xd   :  { %1710 = vmatprep.subr.bf16.mxu1 %v2168_v10  ;;  %v148_v29 = vsel %vm136_vm1, %v143_v24, %v147_v19  ;;  %v433_v38 = vor.u32 %v432_v35, %v428_v31 }
   0xe   :  { %1700 = vmatprep.mubr.msk.bf16.mxu0 %vm176_vm0, %v148_v29 }
   0xf   :  { %1699 = vmatpush3.bf16.msra.mxu0 %v2151_v6  ;;  %v438_v39 = vsel %vm136_vm1, %v433_v38, %v437_v36 }
  0x10   :  { %1711 = vmatpush3.bf16.msra.mxu1 %v2168_v10  ;;  %1716 = vmatprep.subr.bf16.mxu0 %v2035_v17 }
  0x11   :  { %1728 = vmatprep.subr.bf16.mxu1 %v2027_v0 }
  0x12   :  { %1701 = vmatmul.mubr.msk.bf16.vlgmr.msra.gmra.mxu0 %vm176_vm0, %v151_v25 }
  0x13   :  { %1713 = vmatmul.mubr.msk.bf16.vlgmr.msra.gmra.mxu1 %vm176_vm0, %v2170_v12  ;;  %1717 = vmatpush3.bf16.msra.mxu0 %v2035_v17 }
  0x14   :  { %1729 = vmatpush3.bf16.msra.mxu1 %v2027_v0  ;;  %1718 = vmatprep.subr.bf16.mxu0 %v2036_v30 }
  0x15   :  { %1730 = vmatprep.subr.bf16.mxu1 %v2126_v2  ;;  %1724 = vmatprep.mubr.msk.bf16.mxu0 %vm176_vm0, %v312_v34 }
  0x16   :  { %1736 = vmatprep.mubr.msk.bf16.mxu1 %vm176_vm0, %v438_v39 }
  0x17   :  { %1719 = vmatpush3.bf16.msra.mxu0 %v2036_v30 }
  0x18   :  { %1731 = vmatpush3.bf16.msra.mxu1 %v2126_v2  ;;  %1720 = vmatprep.subr.bf16.mxu0 %v2037_v37 }
  0x19   :  { %1732 = vmatprep.subr.bf16.mxu1 %v2139_v4 }
  0x1b   :  { %1721 = vmatpush3.bf16.msra.mxu0 %v2037_v37 }
  0x1c   :  { %1733 = vmatpush3.bf16.msra.mxu1 %v2139_v4  ;;  %1722 = vmatprep.subr.bf16.mxu0 %v2038_v40 }
  0x1d   :  { %1734 = vmatprep.subr.bf16.mxu1 %v2151_v6 }
  0x1f   :  { %1723 = vmatpush3.bf16.msra.mxu0 %v2038_v40 }
  0x20   :  { %1735 = vmatpush3.bf16.msra.mxu1 %v2151_v6  ;;  %1740 = vmatprep.subr.bf16.mxu0 %v2121_v1 }
  0x21   :  { %1752 = vmatprep.subr.bf16.mxu1 %v2035_v17 }
  0x22   :  { %1725 = vmatmul.mubr.msk.bf16.vlgmr.msra.gmra.mxu0 %vm176_vm0, %v311_v26 }
  0x23   :  { %1737 = vmatmul.mubr.msk.bf16.vlgmr.msra.gmra.mxu1 %vm176_vm0, %v441_v42  ;;  %1741 = vmatpush3.bf16.msra.mxu0 %v2121_v1 }
  0x24   :  { %1753 = vmatpush3.bf16.msra.mxu1 %v2035_v17  ;;  %1742 = vmatprep.subr.bf16.mxu0 %v2132_v3 }
  0x25   :  { %1754 = vmatprep.subr.bf16.mxu1 %v2036_v30  ;;  %1748 = vmatprep.mubr.msk.bf16.mxu0 %vm176_vm0, %v425_v27 }
  0x26   :  { %1760 = vmatprep.mubr.msk.bf16.mxu1 %vm176_vm0, %v552_v45 }
  0x27   :  { %1743 = vmatpush3.bf16.msra.mxu0 %v2132_v3 }
  0x28   :  { %1755 = vmatpush3.bf16.msra.mxu1 %v2036_v30  ;;  %1744 = vmatprep.subr.bf16.mxu0 %v2145_v5 }
  0x29   :  { %1756 = vmatprep.subr.bf16.mxu1 %v2037_v37 }
  0x2b   :  { %1745 = vmatpush3.bf16.msra.mxu0 %v2145_v5  ;;  %v30_v5 = vlaneseq }
  0x2c   :  { %1757 = vmatpush3.bf16.msra.mxu1 %v2037_v37  ;;  %1746 = vmatprep.subr.bf16.mxu0 %v2168_v10 }
  0x2d   :  { %1758 = vmatprep.subr.bf16.mxu1 %v2038_v40  ;;  %v2383_v8 = vshrl.u32 %v30_v5, 7 }
  0x2f   :  { %1747 = vmatpush3.bf16.msra.mxu0 %v2168_v10  ;;  %v2386_v14 = vadd.s32 16, %v2383_v8  ;;  %vm34_vm4 = vcmp.ge.s32.totalorder %v2383_v8, 1 }
  0x30   :  { %1759 = vmatpush3.bf16.msra.mxu1 %v2038_v40  ;;  %1764 = vmatprep.subr.mxu0 %v2067_v46  ;;  %vm2564_vm8 = vmpackc.low %vm2069_vm7, %vm34_vm4 }
  0x31   :  { %1799 = vmatprep.subr.mxu1 %v2067_v46  ;;  %vm39_vm5 = vcmp.lt.s32.totalorder %v2386_v14, 17  ;;  %v2060_v14 = vld [vmem:[%s2800_s2 + $0x90] sm:$0xff]  }
  0x32   :  { %1749 = vmatmul.mubr.msk.bf16.vlgmr.msra.gmra.mxu0 %vm176_vm0, %v426_v28 }
  0x33   :  { %1761 = vmatmul.mubr.msk.bf16.vlgmr.msra.gmra.mxu1 %vm176_vm0, %v551_v44  ;;  %1765 = vmatpush3.msra.mxu0 %v2237_v47 }
  0x34   :  { %1800 = vmatpush3.msra.mxu1 %v2237_v47  ;;  %1766 = vmatprep.subr.mxu0 %v2067_v46 }
  0x35   :  { %1801 = vmatprep.subr.mxu1 %v2067_v46  ;;  %1767 = vmatpush3.msra.mxu0 %v2246_v48 }
  0x36   :  { %1802 = vmatpush3.msra.mxu1 %v2246_v48  ;;  %1768 = vmatprep.subr.mxu0 %v2067_v46 }
  0x37   :  { %1803 = vmatprep.subr.mxu1 %v2067_v46  ;;  %1769 = vmatpush3.msra.mxu0 %v2255_v49 }
  0x38   :  { %1804 = vmatpush3.msra.mxu1 %v2255_v49  ;;  %1770 = vmatprep.subr.mxu0 %v2067_v46 }
  0x39   :  { %1805 = vmatprep.subr.mxu1 %v2067_v46  ;;  %1771 = vmatpush3.msra.mxu0 %v2264_v50 }
  0x3a   :  { %1806 = vmatpush3.msra.mxu1 %v2264_v50  ;;  %1772 = vmatprep.subr.mxu0 %v2067_v46 }
  0x3b   :  { %1807 = vmatprep.subr.mxu1 %v2067_v46  ;;  %1773 = vmatpush3.msra.mxu0 %v2273_v51 }
  0x3c   :  { %1808 = vmatpush3.msra.mxu1 %v2273_v51  ;;  %1774 = vmatprep.subr.mxu0 %v2067_v46 }
  0x3d   :  { %1809 = vmatprep.subr.mxu1 %v2067_v46  ;;  %1775 = vmatpush3.msra.mxu0 %v2282_v52 }
  0x3e   :  { %1810 = vmatpush3.msra.mxu1 %v2282_v52  ;;  %1776 = vmatprep.subr.mxu0 %v2067_v46 }
  0x3f   :  { %1811 = vmatprep.subr.mxu1 %v2067_v46  ;;  %1777 = vmatpush3.msra.mxu0 %v2291_v53 }
  0x40   :  { %1812 = vmatpush3.msra.mxu1 %v2291_v53  ;;  %1778 = vmatprep.subr.mxu0 %v2067_v46 }
  0x41   :  { %1813 = vmatprep.subr.mxu1 %v2067_v46  ;;  %1779 = vmatpush3.msra.mxu0 %v2300_v54 }
  0x42   :  { %1814 = vmatpush3.msra.mxu1 %v2300_v54  ;;  %1780 = vmatprep.subr.mxu0 %v2067_v46 }
  0x43   :  { %1815 = vmatprep.subr.mxu1 %v2067_v46  ;;  %1781 = vmatpush3.msra.mxu0 %v2309_v55 }
  0x44   :  { %1816 = vmatpush3.msra.mxu1 %v2309_v55  ;;  %1782 = vmatprep.subr.mxu0 %v2067_v46 }
  0x45   :  { %1817 = vmatprep.subr.mxu1 %v2067_v46  ;;  %1783 = vmatpush3.msra.mxu0 %v2318_v56 }
  0x46   :  { %1818 = vmatpush3.msra.mxu1 %v2318_v56  ;;  %1784 = vmatprep.subr.mxu0 %v2067_v46 }
  0x47   :  { %1819 = vmatprep.subr.mxu1 %v2067_v46  ;;  %1785 = vmatpush3.msra.mxu0 %v2327_v57 }
  0x48   :  { %1820 = vmatpush3.msra.mxu1 %v2327_v57  ;;  %1786 = vmatprep.subr.mxu0 %v2067_v46 }
  0x49   :  { %1821 = vmatprep.subr.mxu1 %v2067_v46  ;;  %1787 = vmatpush3.msra.mxu0 %v2336_v58 }
  0x4a   :  { %1822 = vmatpush3.msra.mxu1 %v2336_v58  ;;  %1788 = vmatprep.subr.mxu0 %v2067_v46 }
  0x4b   :  { %1823 = vmatprep.subr.mxu1 %v2067_v46  ;;  %1789 = vmatpush3.msra.mxu0 %v2345_v59 }
  0x4c   :  { %1824 = vmatpush3.msra.mxu1 %v2345_v59  ;;  %1790 = vmatprep.subr.mxu0 %v2067_v46 }
  0x4d   :  { %1825 = vmatprep.subr.mxu1 %v2067_v46  ;;  %1791 = vmatpush3.msra.mxu0 %v2351_v60 }
  0x4e   :  { %1826 = vmatpush3.msra.mxu1 %v2351_v60  ;;  %1792 = vmatprep.subr.mxu0 %v2067_v46 }
  0x4f   :  { %1827 = vmatprep.subr.mxu1 %v2067_v46  ;;  %1793 = vmatpush3.msra.mxu0 %v2360_v61 }
  0x50   :  { %1796 = vmatprep.mubr.msk.f32.mxu0 %vm2068_vm3, %v2067_v46  ;;  %1794 = vmatprep.subr.mxu0 %v2067_v46 }
  0x51   :  { %1828 = vmatpush3.msra.mxu1 %v2360_v61  ;;  %1795 = vmatpush3.msra.mxu0 %v2369_v62 }
  0x52   :  { %1829 = vmatprep.subr.mxu1 %v2067_v46  ;;  %1831 = vmatprep.mubr.msk.f32.mxu1 %vm2068_vm3, %v2067_v46 }
  0x53   :  { %1830 = vmatpush3.msra.mxu1 %v2369_v62  ;;  %1834 = vmatprep.subr.bf16.mxu0 %v2067_v46 }
  0x54   :  { %1854 = vmatprep.subr.bf16.mxu1 %v2067_v46 }
  0xd2   :  { %v1702_v63 = vpop.f32.mrf.mxu0 }
  0xd3   :  { %v1714_v0 = vpop.f32.mrf.mxu1 }
  0xd4   :  { %v217_v1 = vpop.f32.mrf.mxu0  ;;  %v302_v17 = vadd.f32 %v1714_v0, %v1702_v63 }
  0xd5   :  { %v293_v2 = vpop.f32.mrf.mxu1 }
  0xd6   :  { %v1703_v3 = vpop.f32.mrf.mxu0  ;;  %v294_v13 = vadd.f32 %v293_v2, %v217_v1 }
  0xd7   :  { %v1715_v4 = vpop.f32.mrf.mxu1 }
  0xd8   :  { %v220_v6 = vpop.f32.mrf.mxu0 }
  0xd9   :  { %v296_v7 = vpop.f32.mrf.mxu1 }
  0xda   :  { %v297_v18 = vadd.f32 %v296_v7, %v220_v6 }
  0xe2   :  { %v1726_v9 = vpop.f32.mrf.mxu0 }
  0xe3   :  { %v1738_v10 = vpop.f32.mrf.mxu1  ;;  %v393_v21 = vadd.f32 %v1726_v9, %v302_v17 }
  0xe4   :  { %v377_v11 = vpop.f32.mrf.mxu0 }
  0xe5   :  { %v482_v12 = vpop.f32.mrf.mxu1  ;;  %v391_v19 = vadd.f32 %v377_v11, %v294_v13  ;;  %v2398_v24 = vsel %vm39_vm5, %v393_v21, 0.0 }
  0xe6   :  { %v1727_v15 = vpop.f32.mrf.mxu0  ;;  %v410_v28 = vmul.f32 %v2398_v24, %v2398_v24  ;;  %v399_v31 = vsel %vm398_vm6, %v2398_v24, 0.0 }
  0xe7   :  { %v1739_v16 = vpop.f32.mrf.mxu1  ;;  %v2394_v23 = vsel %vm34_vm4, %v391_v19, 0.0 }
  0xe8   :  { %v380_v20 = vpop.f32.mrf.mxu0  ;;  %v408_v26 = vmul.f32 %v2394_v23, %v2394_v23  ;;  %v412_v36 = vsel %vm398_vm6, %v410_v28, 0.0 }
  0xe9   :  { %v2389_v22 = vadd.f32 %v380_v20, %v297_v18  ;;  %v485_v29 = vpop.f32.mrf.mxu1 }
  0xeb   :  { %v409_v25 = vmul.f32 %v2389_v22, %v2389_v22  ;;  %v397_v27 = vadd.f32 %v2394_v23, %v2389_v22 }
  0xed   :  { %v411_v30 = vadd.f32 %v409_v25, %v408_v26  ;;  %v400_v34 = vadd.f32 %v399_v31, %v397_v27 }
  0xef   :  { %v413_v39 = vadd.f32 %v412_v36, %v411_v30  ;;  %v401_v44 = vrot.slane %v400_v34, 4 }
  0xf1   :  { %v414_v0 = vrot.slane %v413_v39, 4  ;;  %v402_v5 = vadd.f32 %v401_v44, %v400_v34  ;;  %v2439_v44 = vld [vmem:[%s2800_s2 + $0x38] sm:$0xff]  }
  0xf2   :  { %v1750_v32 = vpop.f32.mrf.mxu0 }
  0xf3   :  { %v1762_v33 = vpop.f32.mrf.mxu1  ;;  %v543_v35 = vadd.f32 %v1750_v32, %v1738_v10  ;;  %v415_v9 = vadd.f32 %v414_v0, %v413_v39  ;;  %v403_v15 = vrot.slane %v402_v5, 2  ;;  %v2458_v0 = vld [vmem:[%s2800_s2 + $0x28] sm:$0xff]  }
  0xf4   :  { %v534_v37 = vpop.f32.mrf.mxu0 }
  0xf5   :  { %v593_v38 = vpop.f32.mrf.mxu1  ;;  %v609_v40 = vadd.f32 %v1762_v33, %v543_v35  ;;  %v535_v41 = vadd.f32 %v534_v37, %v482_v12  ;;  %v416_v19 = vrot.slane %v415_v9, 2  ;;  %v404_v25 = vadd.f32 %v403_v15, %v402_v5  ;;  %v2481_v5 = vld [vmem:[%s2800_s2 + $0x68] sm:$0xff]   ;;  %v2526_v15 = vld [vmem:[%s2800_s2] sm:$0xff]  }
  0xf6   :  { %v1751_v42 = vpop.f32.mrf.mxu0 }
  0xf7   :  { %v1763_v43 = vpop.f32.mrf.mxu1  ;;  %v607_v45 = vadd.f32 %v593_v38, %v535_v41  ;;  %v2413_v1 = vsel %vm39_vm5, %v609_v40, 0.0  ;;  %v417_v30 = vadd.f32 %v416_v19, %v415_v9  ;;  %v405_v33 = vrot.slane %v404_v25, 1  ;;  %v2495_v9 = vld [vmem:[%s2800_s2 + $0x60] sm:$0xff]  }
  0xf8   :  { %v537_v63 = vpop.f32.mrf.mxu0  ;;  %v625_v7 = vmul.f32 %v2413_v1, %v2413_v1  ;;  %v614_v13 = vsel %vm398_vm6, %v2413_v1, 0.0 }
  0xf9   :  { %v538_v2 = vadd.f32 %v537_v63, %v485_v29  ;;  %v2417_v3 = vsel %vm34_vm4, %v607_v45, 0.0  ;;  %v596_v4 = vpop.f32.mrf.mxu1  ;;  %v418_v35 = vrot.slane %v417_v30, 1  ;;  %v406_v37 = vadd.f32 %v405_v33, %v404_v25  ;;  %v2446_v45 = vld [vmem:[%s2800_s2 + $0x30] sm:$0xff]   ;;  %v2453_v63 = vld [vmem:[%s2800_s2 + $0x78] sm:$0xff]  }
  0xfa   :  { %v623_v10 = vmul.f32 %v2417_v3, %v2417_v3  ;;  %v627_v18 = vsel %vm398_vm6, %v625_v7, 0.0  ;;  %v2486_v7 = vld [vmem:[%s2800_s2 + $0x18] sm:$0xff]  }
  0xfb   :  { %v2419_v6 = vadd.f32 %v596_v4, %v538_v2  ;;  %v419_v41 = vadd.f32 %v418_v35, %v417_v30  ;;  %v2467_v2 = vld [vmem:[%s2800_s2 + $0x70] sm:$0xff]   ;;  %v2472_v4 = vld [vmem:[%s2800_s2 + $0x20] sm:$0xff]  }
  0xfd   :  { %v613_v11 = vadd.f32 %v2417_v3, %v2419_v6  ;;  %v624_v12 = vmul.f32 %v2419_v6, %v2419_v6 }
  0xff   :  { %v615_v16 = vadd.f32 %v614_v13, %v613_v11  ;;  %v626_v17 = vadd.f32 %v624_v12, %v623_v10  ;;  %v2500_v10 = vld [vmem:[%s2800_s2 + $0x10] sm:$0xff]   ;;  %v2509_v11 = vld [vmem:[%s2800_s2 + $0x58] sm:$0xff]   ;;  %v2514_v12 = vld [vmem:[%s2800_s2 + $0x8] sm:$0xff]  }
 0x100   :  { %v2521_v13 = vld [vmem:[%s2800_s2 + $0x50] sm:$0xff]  }
 0x101   :  { %v616_v20 = vrot.slane %v615_v16, 4  ;;  %v628_v21 = vadd.f32 %v627_v18, %v626_v17  ;;  %v2544_v17 = vld [vmem:[%s2800_s2 + $0x40] sm:$0xff]  }
 0x103   :  { %v617_v26 = vadd.f32 %v616_v20, %v615_v16  ;;  %v629_v27 = vrot.slane %v628_v21, 4  ;;  %v2535_v16 = vld [vmem:[%s2800_s2 + $0x48] sm:$0xff]  }
 0x105   :  { %v618_v28 = vrot.slane %v617_v26, 2  ;;  %v630_v29 = vadd.f32 %v629_v27, %v628_v21 }
 0x107   :  { %v619_v31 = vadd.f32 %v618_v28, %v617_v26  ;;  %v631_v32 = vrot.slane %v630_v29, 2  ;;  %v778_v28 = vld [vmem:[%s2801_s4] sm:$0x1] }
 0x109   :  { %v620_v34 = vrot.slane %v619_v31, 1  ;;  %v632_v36 = vadd.f32 %v631_v32, %v630_v29  ;;  %v2552_v29 = vsub.s32 0, %v2383_v8  ;;  %v782_v32 = vld [vmem:[%s2802_s5] sm:$0x1] }
 0x10a   :  { %v2058_v8 = vld [vmem:[%s2800_s2 + $0xa0] sm:$0xff]  }
 0x10b   :  { %v621_v38 = vadd.f32 %v620_v34, %v619_v31  ;;  %v633_v39 = vrot.slane %v632_v36, 1 }
 0x10d   :  { %v622_v40 = vadd.f32 %v621_v38, %v406_v37  ;;  %v634_v42 = vadd.f32 %v633_v39, %v632_v36 }
 0x10f   :  { %1797 = vmatmul.mubr.f32.vlgmr.msra.gmra.mxu0 %v622_v40  ;;  %v635_v43 = vadd.f32 %v634_v42, %v419_v41 }
 0x110   :  { %1850 = vmatprep.mubr.msk.bf16.mxu0 %vm2068_vm3, %v2067_v46  ;;  %1835 = vmatpush3.bf16.msra.mxu0 %v2453_v63 }
 0x111   :  { %1832 = vmatmul.mubr.f32.vlgmr.msra.gmra.mxu1 %v635_v43  ;;  %1836 = vmatprep.subr.bf16.mxu0 %v2067_v46 }
 0x112   :  { %1870 = vmatprep.mubr.msk.bf16.mxu1 %vm2068_vm3, %v2067_v46  ;;  %1855 = vmatpush3.bf16.msra.mxu1 %v2439_v44 }
 0x113   :  { %1856 = vmatprep.subr.bf16.mxu1 %v2067_v46 }
 0x114   :  { %1837 = vmatpush3.bf16.msra.mxu0 %v2467_v2 }
 0x115   :  { %1838 = vmatprep.subr.bf16.mxu0 %v2067_v46 }
 0x116   :  { %1857 = vmatpush3.bf16.msra.mxu1 %v2446_v45 }
 0x117   :  { %1858 = vmatprep.subr.bf16.mxu1 %v2067_v46 }
 0x118   :  { %1839 = vmatpush3.bf16.msra.mxu0 %v2481_v5 }
 0x119   :  { %1840 = vmatprep.subr.bf16.mxu0 %v2067_v46 }
 0x11a   :  { %1859 = vmatpush3.bf16.msra.mxu1 %v2458_v0 }
 0x11b   :  { %1860 = vmatprep.subr.bf16.mxu1 %v2067_v46 }
 0x11c   :  { %1841 = vmatpush3.bf16.msra.mxu0 %v2495_v9 }
 0x11d   :  { %1842 = vmatprep.subr.bf16.mxu0 %v2067_v46 }
 0x11e   :  { %1861 = vmatpush3.bf16.msra.mxu1 %v2472_v4 }
 0x11f   :  { %1862 = vmatprep.subr.bf16.mxu1 %v2067_v46 }
 0x120   :  { %1843 = vmatpush3.bf16.msra.mxu0 %v2509_v11 }
 0x121   :  { %1844 = vmatprep.subr.bf16.mxu0 %v2067_v46 }
 0x122   :  { %1863 = vmatpush3.bf16.msra.mxu1 %v2486_v7 }
 0x123   :  { %1864 = vmatprep.subr.bf16.mxu1 %v2067_v46 }
 0x124   :  { %1845 = vmatpush3.bf16.msra.mxu0 %v2521_v13 }
 0x125   :  { %1846 = vmatprep.subr.bf16.mxu0 %v2067_v46 }
 0x126   :  { %1865 = vmatpush3.bf16.msra.mxu1 %v2500_v10 }
 0x127   :  { %1866 = vmatprep.subr.bf16.mxu1 %v2067_v46 }
 0x128   :  { %1847 = vmatpush3.bf16.msra.mxu0 %v2535_v16 }
 0x129   :  { %1848 = vmatprep.subr.bf16.mxu0 %v2067_v46 }
 0x12a   :  { %1867 = vmatpush3.bf16.msra.mxu1 %v2514_v12 }
 0x12b   :  { %1868 = vmatprep.subr.bf16.mxu1 %v2067_v46 }
 0x12c   :  { %1849 = vmatpush3.bf16.msra.mxu0 %v2544_v17 }
 0x12d   :  { %1874 = vmatprep.subr.bf16.mxu0 %v2067_v46 }
 0x12e   :  { %1869 = vmatpush3.bf16.msra.mxu1 %v2526_v15 }
 0x12f   :  { %1894 = vmatprep.subr.bf16.mxu1 %v2067_v46 }
 0x1cf   :  { %v702_v18 = vpop.f32.mrf.mxu0 }
 0x1d0   :  { %v776_v19 = vmul.f32 %v702_v18, %v702_v18 }
 0x1d1   :  { %v1798_v20 = vpop.f32.mrf.mxu0  ;;  %v772_v21 = vpop.f32.mrf.mxu1 }
 0x1d2   :  { %v777_v25 = vsub.f32 %v772_v21, %v776_v19 }
 0x1d3   :  { %v1833_v26 = vpop.f32.mrf.mxu1 }
 0x1d4   :  { %v779_v27 = vadd.f32 1e-05, %v777_v25 }
 0x1d6   :  { %2063 = vrsqrt.f32 %v779_v27 }
 0x1e3   :  { %v2064_v30 = vpop.eup %2063 }
 0x1e4   :  { %v781_v31 = vmul.f32 %v2064_v30, %v778_v28 }
 0x1e6   :  { %v783_v33 = vmul.f32 %v781_v31, %v702_v18  ;;  %v789_v34 = vrot.slane %v781_v31, %v2552_v29 }
 0x1e8   :  { %v784_v35 = vsub.f32 %v782_v32, %v783_v33  ;;  %v791_v37 = vmul.f32 %v789_v34, %v2394_v23  ;;  %v792_v38 = vmul.f32 %v789_v34, %v2389_v22  ;;  %v793_v39 = vmul.f32 %v789_v34, %v2398_v24 }
 0x1e9   :  { %v1117_v28 = vmul.f32 %v789_v34, %v2417_v3 }
 0x1ea   :  { %v798_v36 = vrot.slane %v784_v35, %v2552_v29  ;;  %v2055_v35 = vld [vmem:[%s2800_s2 + $0xb8] sm:$0xff]  }
 0x1ec   :  { %v800_v40 = vadd.f32 %v798_v36, %v791_v37  ;;  %v801_v41 = vadd.f32 %v798_v36, %v792_v38  ;;  %v802_v42 = vadd.f32 %v798_v36, %v793_v39  ;;  %v2586_v32 = vadd.f32 %v1117_v28, %v798_v36 }
 0x1ed   :  { %v1118_v37 = vmul.f32 %v789_v34, %v2419_v6  ;;  %v1119_v39 = vmul.f32 %v789_v34, %v2413_v1 }
 0x1ee   :  { %v803_v43 = vmax.f32 %v800_v40, 0.0  ;;  %v804_v19 = vmax.f32 %v801_v41, 0.0  ;;  %v805_v20 = vmax.f32 %v802_v42, 0.0  ;;  %v1123_v40 = vmax.f32 %v2586_v32, 0.0 }
 0x1ef   :  { %v2595_v3 = vadd.f32 %v1118_v37, %v798_v36  ;;  %v1122_v6 = vadd.f32 %v1119_v39, %v798_v36 }
 0x1f0   :  { %v1519_v21 = vpack.c.bf16 %v804_v19, %v803_v43  ;;  %v806_v23 = vsel %vm34_vm4, %v803_v43, 0.0  ;;  %v808_v22 = vsel %vm39_vm5, %v805_v20, 0.0  ;;  %v1126_v1 = vsel %vm34_vm4, %v1123_v40, 0.0 }
 0x1f1   :  { %v2572_v24 = vpack.c.bf16 %v804_v19, %v806_v23  ;;  %v2574_v25 = vpack.c.bf16 %v808_v22, %v808_v22  ;;  %v1124_v41 = vmax.f32 %v2595_v3, 0.0  ;;  %v1125_v34 = vmax.f32 %v1122_v6, 0.0 }
 0x1f2   :  { %1871 = vmatmul.mubr.msk.bf16.vlgmr.msra.gmra.mxu1 %vm2564_vm8, %v1519_v21 }
 0x1f3   :  { %1895 = vmatpush3.bf16.msra.mxu1 %v2453_v63  ;;  %v814_v26 = vshll.u32 %v2572_v24, 16  ;;  %v819_v27 = vshll.u32 %v2574_v25, 16  ;;  %1910 = vmatprep.mubr.msk.bf16.mxu1 %vm2068_vm3, %v2067_v46  ;;  %v812_v30 = vshrl.u32 %v2572_v24, 16  ;;  %v2620_v36 = vpack.c.bf16 %v1124_v41, %v1126_v1 }
 0x1f4   :  { %1896 = vmatprep.subr.bf16.mxu1 %v2067_v46 }
 0x1f5   :  { %v816_v31 = vrot.slane %v814_v26, 1  ;;  %v821_v63 = vrot.slane %v819_v27, 1  ;;  %v1134_v42 = vshll.u32 %v2620_v36, 16  ;;  %v2062_v26 = vld [vmem:[%s2800_s2 + $0x80] sm:$0xff]   ;;  %v1005_v27 = vrot.slane %v2574_v25, 1 }
 0x1f7   :  { %1897 = vmatpush3.bf16.msra.mxu1 %v2467_v2  ;;  %v817_v33 = vor.u32 %v816_v31, %v812_v30  ;;  %v2056_v2 = vld [vmem:[%s2800_s2 + $0xb0] sm:$0xff]   ;;  %v1136_v19 = vrot.slane %v1134_v42, 1 }
 0x1f8   :  { %1898 = vmatprep.subr.bf16.mxu1 %v2067_v46 }
 0x1f9   :  { %v822_v38 = vsel %vm136_vm1, %v817_v33, %v821_v63 }
 0x1fa   :  { %1851 = vmatmul.mubr.bf16.vlgmr.msra.gmra.mxu0 %v822_v38 }
 0x1fb   :  { %1875 = vmatpush3.bf16.msra.mxu0 %v2055_v35  ;;  %1899 = vmatpush3.bf16.msra.mxu1 %v2481_v5  ;;  %v2057_v5 = vld [vmem:[%s2800_s2 + $0xa8] sm:$0xff]  }
 0x1fc   :  { %1876 = vmatprep.subr.bf16.mxu0 %v2067_v46  ;;  %1900 = vmatprep.subr.bf16.mxu1 %v2067_v46 }
 0x1fd   :  { %1890 = vmatprep.mubr.msk.bf16.mxu0 %vm2068_vm3, %v2067_v46 }
 0x1ff   :  { %1877 = vmatpush3.bf16.msra.mxu0 %v2056_v2  ;;  %1901 = vmatpush3.bf16.msra.mxu1 %v2495_v9  ;;  %v1128_v9 = vsel %vm39_vm5, %v1125_v34, 0.0 }
 0x200   :  { %1878 = vmatprep.subr.bf16.mxu0 %v2067_v46  ;;  %1902 = vmatprep.subr.bf16.mxu1 %v2067_v46  ;;  %v2635_v43 = vpack.c.bf16 %v1128_v9, %v1128_v9 }
 0x202   :  { %v1139_v20 = vshll.u32 %v2635_v43, 16 }
 0x203   :  { %1879 = vmatpush3.bf16.msra.mxu0 %v2057_v5  ;;  %1903 = vmatpush3.bf16.msra.mxu1 %v2509_v11  ;;  %v2059_v11 = vld [vmem:[%s2800_s2 + $0x98] sm:$0xff]  }
 0x204   :  { %1880 = vmatprep.subr.bf16.mxu0 %v2067_v46  ;;  %1904 = vmatprep.subr.bf16.mxu1 %v2067_v46  ;;  %v1141_v23 = vrot.slane %v1139_v20, 1 }
 0x207   :  { %1881 = vmatpush3.bf16.msra.mxu0 %v2058_v8  ;;  %1905 = vmatpush3.bf16.msra.mxu1 %v2521_v13  ;;  %v1132_v13 = vshrl.u32 %v2620_v36, 16 }
 0x208   :  { %1882 = vmatprep.subr.bf16.mxu0 %v2067_v46  ;;  %1906 = vmatprep.subr.bf16.mxu1 %v2067_v46 }
 0x209   :  { %v1137_v21 = vor.u32 %v1136_v19, %v1132_v13 }
 0x20b   :  { %1883 = vmatpush3.bf16.msra.mxu0 %v2059_v11  ;;  %1907 = vmatpush3.bf16.msra.mxu1 %v2535_v16  ;;  %v2061_v16 = vld [vmem:[%s2800_s2 + $0x88] sm:$0xff]   ;;  %v1142_v22 = vsel %vm136_vm1, %v1137_v21, %v1141_v23 }
 0x20c   :  { %1884 = vmatprep.subr.bf16.mxu0 %v2067_v46  ;;  %1908 = vmatprep.subr.bf16.mxu1 %v2067_v46 }
 0x20f   :  { %1885 = vmatpush3.bf16.msra.mxu0 %v2060_v14  ;;  %1909 = vmatpush3.bf16.msra.mxu1 %v2544_v17  ;;  %v1004_v17 = vrot.slane %v2572_v24, 1 }
 0x210   :  { %1886 = vmatprep.subr.bf16.mxu0 %v2067_v46  ;;  %1934 = vmatprep.subr.bf16.mxu1 %v2067_v46 }
 0x211   :  { %v1006_v28 = vsel %vm309_vm2, %v1004_v17, %v1005_v27 }
 0x212   :  { %1911 = vmatmul.mubr.bf16.vlgmr.msra.gmra.mxu1 %v1142_v22 }
 0x213   :  { %1887 = vmatpush3.bf16.msra.mxu0 %v2061_v16  ;;  %1935 = vmatpush3.bf16.msra.mxu1 %v2055_v35 }
 0x214   :  { %1888 = vmatprep.subr.bf16.mxu0 %v2067_v46  ;;  %1936 = vmatprep.subr.bf16.mxu1 %v2067_v46 }
 0x215   :  { %1950 = vmatprep.mubr.msk.bf16.mxu1 %vm2068_vm3, %v2067_v46 }
 0x217   :  { %1889 = vmatpush3.bf16.msra.mxu0 %v2062_v26  ;;  %1937 = vmatpush3.bf16.msra.mxu1 %v2056_v2 }
 0x218   :  { %1914 = vmatprep.subr.bf16.mxu0 %v2067_v46  ;;  %1938 = vmatprep.subr.bf16.mxu1 %v2067_v46 }
 0x21a   :  { %1891 = vmatmul.mubr.bf16.vlgmr.msra.gmra.mxu0 %v1006_v28 }
 0x21b   :  { %1915 = vmatpush3.bf16.msra.mxu0 %v2439_v44  ;;  %1939 = vmatpush3.bf16.msra.mxu1 %v2057_v5  ;;  %v1228_v44 = vrot.slane %v2620_v36, 1 }
 0x21c   :  { %1916 = vmatprep.subr.bf16.mxu0 %v2067_v46  ;;  %1940 = vmatprep.subr.bf16.mxu1 %v2067_v46 }
 0x21d   :  { %1930 = vmatprep.mubr.msk.bf16.mxu0 %vm2068_vm3, %v2067_v46 }
 0x21f   :  { %1917 = vmatpush3.bf16.msra.mxu0 %v2446_v45  ;;  %1941 = vmatpush3.bf16.msra.mxu1 %v2058_v8  ;;  %v1229_v45 = vrot.slane %v2635_v43, 1 }
 0x220   :  { %1918 = vmatprep.subr.bf16.mxu0 %v2067_v46  ;;  %1942 = vmatprep.subr.bf16.mxu1 %v2067_v46 }
 0x223   :  { %1919 = vmatpush3.bf16.msra.mxu0 %v2458_v0  ;;  %1943 = vmatpush3.bf16.msra.mxu1 %v2059_v11  ;;  %v1230_v0 = vsel %vm309_vm2, %v1228_v44, %v1229_v45 }
 0x224   :  { %1920 = vmatprep.subr.bf16.mxu0 %v2067_v46  ;;  %1944 = vmatprep.subr.bf16.mxu1 %v2067_v46 }
 0x227   :  { %1921 = vmatpush3.bf16.msra.mxu0 %v2472_v4  ;;  %1945 = vmatpush3.bf16.msra.mxu1 %v2060_v14  ;;  %v1530_v4 = vpack.c.bf16 %v1124_v41, %v1123_v40 }
 0x228   :  { %1922 = vmatprep.subr.bf16.mxu0 %v2067_v46  ;;  %1946 = vmatprep.subr.bf16.mxu1 %v2067_v46 }
 0x22b   :  { %1923 = vmatpush3.bf16.msra.mxu0 %v2486_v7  ;;  %1947 = vmatpush3.bf16.msra.mxu1 %v2061_v16 }
 0x22c   :  { %1924 = vmatprep.subr.bf16.mxu0 %v2067_v46  ;;  %1948 = vmatprep.subr.bf16.mxu1 %v2067_v46 }
 0x22f   :  { %1925 = vmatpush3.bf16.msra.mxu0 %v2500_v10  ;;  %1949 = vmatpush3.bf16.msra.mxu1 %v2062_v26 }
 0x230   :  { %1926 = vmatprep.subr.bf16.mxu0 %v2067_v46  ;;  %1989 = vmatprep.subr.mxu1 %v2067_v46 }
 0x232   :  { %1951 = vmatmul.mubr.bf16.vlgmr.msra.gmra.mxu1 %v1230_v0 }
 0x233   :  { %1927 = vmatpush3.bf16.msra.mxu0 %v2514_v12  ;;  %1990 = vmatpush3.msra.mxu1 %v2237_v47 }
 0x234   :  { %1928 = vmatprep.subr.bf16.mxu0 %v2067_v46  ;;  %1991 = vmatprep.subr.mxu1 %v2067_v46 }
 0x235   :  { %1992 = vmatpush3.msra.mxu1 %v2246_v48  ;;  %2021 = vmatprep.mubr.msk.f32.mxu1 %vm2068_vm3, %v2067_v46 }
 0x236   :  { %1993 = vmatprep.subr.mxu1 %v2067_v46 }
 0x237   :  { %1929 = vmatpush3.bf16.msra.mxu0 %v2526_v15  ;;  %1994 = vmatpush3.msra.mxu1 %v2255_v49 }
 0x238   :  { %1954 = vmatprep.subr.mxu0 %v2067_v46  ;;  %1995 = vmatprep.subr.mxu1 %v2067_v46 }
 0x239   :  { %1996 = vmatpush3.msra.mxu1 %v2264_v50 }
 0x23a   :  { %1931 = vmatmul.mubr.msk.bf16.vlgmr.msra.gmra.mxu0 %vm2564_vm8, %v1530_v4  ;;  %1997 = vmatprep.subr.mxu1 %v2067_v46 }
 0x23b   :  { %1955 = vmatpush3.msra.mxu0 %v2237_v47  ;;  %1998 = vmatpush3.msra.mxu1 %v2273_v51 }
 0x23c   :  { %1956 = vmatprep.subr.mxu0 %v2067_v46  ;;  %1999 = vmatprep.subr.mxu1 %v2067_v46 }
 0x23d   :  { %1957 = vmatpush3.msra.mxu0 %v2246_v48  ;;  %2000 = vmatpush3.msra.mxu1 %v2282_v52 }
 0x23e   :  { %1958 = vmatprep.subr.mxu0 %v2067_v46  ;;  %2001 = vmatprep.subr.mxu1 %v2067_v46 }
 0x23f   :  { %1959 = vmatpush3.msra.mxu0 %v2255_v49  ;;  %2002 = vmatpush3.msra.mxu1 %v2291_v53 }
 0x240   :  { %1960 = vmatprep.subr.mxu0 %v2067_v46  ;;  %2003 = vmatprep.subr.mxu1 %v2067_v46 }
 0x241   :  { %1961 = vmatpush3.msra.mxu0 %v2264_v50  ;;  %2004 = vmatpush3.msra.mxu1 %v2300_v54 }
 0x242   :  { %1962 = vmatprep.subr.mxu0 %v2067_v46  ;;  %2005 = vmatprep.subr.mxu1 %v2067_v46 }
 0x243   :  { %1963 = vmatpush3.msra.mxu0 %v2273_v51  ;;  %2006 = vmatpush3.msra.mxu1 %v2309_v55 }
 0x244   :  { %1964 = vmatprep.subr.mxu0 %v2067_v46  ;;  %2007 = vmatprep.subr.mxu1 %v2067_v46 }
 0x245   :  { %1965 = vmatpush3.msra.mxu0 %v2282_v52  ;;  %2008 = vmatpush3.msra.mxu1 %v2318_v56 }
 0x246   :  { %1966 = vmatprep.subr.mxu0 %v2067_v46  ;;  %2009 = vmatprep.subr.mxu1 %v2067_v46 }
 0x247   :  { %1967 = vmatpush3.msra.mxu0 %v2291_v53  ;;  %2010 = vmatpush3.msra.mxu1 %v2327_v57 }
 0x248   :  { %1968 = vmatprep.subr.mxu0 %v2067_v46  ;;  %2011 = vmatprep.subr.mxu1 %v2067_v46 }
 0x249   :  { %1969 = vmatpush3.msra.mxu0 %v2300_v54  ;;  %2012 = vmatpush3.msra.mxu1 %v2336_v58 }
 0x24a   :  { %1970 = vmatprep.subr.mxu0 %v2067_v46  ;;  %2013 = vmatprep.subr.mxu1 %v2067_v46 }
 0x24b   :  { %1971 = vmatpush3.msra.mxu0 %v2309_v55  ;;  %2014 = vmatpush3.msra.mxu1 %v2345_v59 }
 0x24c   :  { %1972 = vmatprep.subr.mxu0 %v2067_v46  ;;  %2015 = vmatprep.subr.mxu1 %v2067_v46 }
 0x24d   :  { %1973 = vmatpush3.msra.mxu0 %v2318_v56  ;;  %2016 = vmatpush3.msra.mxu1 %v2351_v60 }
 0x24e   :  { %1974 = vmatprep.subr.mxu0 %v2067_v46  ;;  %2017 = vmatprep.subr.mxu1 %v2067_v46 }
 0x24f   :  { %1975 = vmatpush3.msra.mxu0 %v2327_v57  ;;  %1986 = vmatprep.mubr.msk.f32.mxu0 %vm2068_vm3, %v2067_v46 }
 0x250   :  { %1976 = vmatprep.subr.mxu0 %v2067_v46  ;;  %2018 = vmatpush3.msra.mxu1 %v2360_v61 }
 0x251   :  { %1977 = vmatpush3.msra.mxu0 %v2336_v58  ;;  %2019 = vmatprep.subr.mxu1 %v2067_v46 }
 0x252   :  { %1978 = vmatprep.subr.mxu0 %v2067_v46  ;;  %2020 = vmatpush3.msra.mxu1 %v2369_v62 }
 0x253   :  { %1979 = vmatpush3.msra.mxu0 %v2345_v59 }
 0x254   :  { %1980 = vmatprep.subr.mxu0 %v2067_v46 }
 0x255   :  { %1981 = vmatpush3.msra.mxu0 %v2351_v60 }
 0x256   :  { %1982 = vmatprep.subr.mxu0 %v2067_v46 }
 0x257   :  { %1983 = vmatpush3.msra.mxu0 %v2360_v61 }
 0x258   :  { %1984 = vmatprep.subr.mxu0 %v2067_v46 }
 0x259   :  { %1985 = vmatpush3.msra.mxu0 %v2369_v62 }
 0x2b2   :  { %v995_v47 = vpop.f32.mrf.mxu1 }
 0x2b4   :  { %v1872_v48 = vpop.f32.mrf.mxu1 }
 0x2b6   :  { %v998_v49 = vpop.f32.mrf.mxu1 }
 0x2b8   :  { %v1873_v50 = vpop.f32.mrf.mxu1 }
 0x2ba   :  { %v906_v51 = vpop.f32.mrf.mxu0 }
 0x2bb   :  { %v996_v52 = vadd.f32 %v995_v47, %v906_v51 }
 0x2bc   :  { %v1852_v53 = vpop.f32.mrf.mxu0 }
 0x2be   :  { %v909_v54 = vpop.f32.mrf.mxu0 }
 0x2bf   :  { %v999_v55 = vadd.f32 %v998_v49, %v909_v54 }
 0x2c0   :  { %v1853_v56 = vpop.f32.mrf.mxu0 }
 0x2d2   :  { %v1178_v57 = vpop.f32.mrf.mxu1 }
 0x2d4   :  { %v1912_v58 = vpop.f32.mrf.mxu1 }
 0x2d6   :  { %v1181_v59 = vpop.f32.mrf.mxu1 }
 0x2d8   :  { %v1913_v60 = vpop.f32.mrf.mxu1 }
 0x2d9   :  { %v1439_v60 = vld [vmem:[%s2804_s7] sm:$0x1] }
 0x2da   :  { %v1090_v7 = vpop.f32.mrf.mxu0 }
 0x2db   :  { %v2767_v15 = vadd.f32 %v1090_v7, %v996_v52 }
 0x2dc   :  { %v1892_v61 = vpop.f32.mrf.mxu0 }
 0x2dd   :  { %v1107_v30 = vmul.f32 %v2767_v15, %v2767_v15 }
 0x2de   :  { %v1093_v10 = vpop.f32.mrf.mxu0 }
 0x2df   :  { %v2765_v12 = vadd.f32 %v1093_v10, %v999_v55 }
 0x2e0   :  { %v1893_v46 = vpop.f32.mrf.mxu0 }
 0x2e1   :  { %v1108_v24 = vmul.f32 %v2765_v12, %v2765_v12  ;;  %v1099_v31 = vadd.f32 %v2765_v12, %v2767_v15 }
 0x2e3   :  { %v1109_v33 = vadd.f32 %v1108_v24, %v1107_v30  ;;  %v1100_v35 = vrot.slane %v1099_v31, 4 }
 0x2e5   :  { %v1110_v3 = vrot.slane %v1109_v33, 4  ;;  %v1101_v40 = vadd.f32 %v1100_v35, %v1099_v31 }
 0x2e7   :  { %v1111_v1 = vadd.f32 %v1110_v3, %v1109_v33  ;;  %v1102_v34 = vrot.slane %v1101_v40, 2 }
 0x2e9   :  { %v1112_v42 = vrot.slane %v1111_v1, 2  ;;  %v1103_v19 = vadd.f32 %v1102_v34, %v1101_v40 }
 0x2eb   :  { %v1113_v20 = vadd.f32 %v1112_v42, %v1111_v1  ;;  %v1104_v16 = vrot.slane %v1103_v19, 1 }
 0x2ed   :  { %v1114_v27 = vrot.slane %v1113_v20, 1  ;;  %v1105_v44 = vadd.f32 %v1104_v16, %v1103_v19 }
 0x2ef   :  { %v1115_v47 = vadd.f32 %v1114_v27, %v1113_v20 }
 0x2f2   :  { %v1266_v62 = vpop.f32.mrf.mxu1 }
 0x2f4   :  { %v1952_v18 = vpop.f32.mrf.mxu1 }
 0x2f6   :  { %v1269_v25 = vpop.f32.mrf.mxu1 }
 0x2f8   :  { %v1953_v32 = vpop.f32.mrf.mxu1 }
 0x2fa   :  { %v1219_v63 = vpop.f32.mrf.mxu0 }
 0x2fb   :  { %v1220_v37 = vadd.f32 %v1219_v63, %v1178_v57  ;;  %v1435_v57 = vld [vmem:[%s2803_s6] sm:$0x1] }
 0x2fc   :  { %v1932_v38 = vpop.f32.mrf.mxu0 }
 0x2fd   :  { %v1273_v2 = vadd.f32 %v1266_v62, %v1220_v37 }
 0x2fe   :  { %v1222_v39 = vpop.f32.mrf.mxu0 }
 0x2ff   :  { %v1223_v6 = vadd.f32 %v1222_v39, %v1181_v59  ;;  %v1283_v36 = vmul.f32 %v1273_v2, %v1273_v2 }
 0x300   :  { %v1933_v41 = vpop.f32.mrf.mxu0 }
 0x301   :  { %v1274_v5 = vadd.f32 %v1269_v25, %v1223_v6 }
 0x303   :  { %v1275_v8 = vadd.f32 %v1274_v5, %v1273_v2  ;;  %v1284_v9 = vmul.f32 %v1274_v5, %v1274_v5 }
 0x305   :  { %v1276_v11 = vrot.slane %v1275_v8, 4  ;;  %v1285_v43 = vadd.f32 %v1284_v9, %v1283_v36 }
 0x307   :  { %v1277_v14 = vadd.f32 %v1276_v11, %v1275_v8  ;;  %v1286_v13 = vrot.slane %v1285_v43, 4 }
 0x309   :  { %v1278_v21 = vrot.slane %v1277_v14, 2  ;;  %v1287_v23 = vadd.f32 %v1286_v13, %v1285_v43 }
 0x30b   :  { %v1279_v22 = vadd.f32 %v1278_v21, %v1277_v14  ;;  %v1288_v26 = vrot.slane %v1287_v23, 2 }
 0x30d   :  { %v1280_v17 = vrot.slane %v1279_v22, 1  ;;  %v1289_v28 = vadd.f32 %v1288_v26, %v1287_v23 }
 0x30f   :  { %v1281_v45 = vadd.f32 %v1280_v17, %v1279_v22  ;;  %v1290_v0 = vrot.slane %v1289_v28, 1 }
 0x311   :  { %v1282_v4 = vadd.f32 %v1281_v45, %v1105_v44  ;;  %v1291_v48 = vadd.f32 %v1290_v0, %v1289_v28 }
 0x313   :  { %1987 = vmatmul.mubr.f32.vlgmr.msra.gmra.mxu0 %v1282_v4  ;;  %v1292_v49 = vadd.f32 %v1291_v48, %v1115_v47 }
 0x315   :  { %2022 = vmatmul.mubr.f32.vlgmr.msra.gmra.mxu1 %v1292_v49 }
 0x3d3   :  { %v1359_v50 = vpop.f32.mrf.mxu0 }
 0x3d4   :  { %v1433_v51 = vmul.f32 %v1359_v50, %v1359_v50 }
 0x3d5   :  { %v1988_v52 = vpop.f32.mrf.mxu0  ;;  %v1429_v53 = vpop.f32.mrf.mxu1 }
 0x3d6   :  { %v1434_v54 = vsub.f32 %v1429_v53, %v1433_v51 }
 0x3d7   :  { %v2023_v55 = vpop.f32.mrf.mxu1 }
 0x3d8   :  { %v1436_v56 = vadd.f32 1e-05, %v1434_v54 }
 0x3da   :  { %2065 = vrsqrt.f32 %v1436_v56 }
 0x3e7   :  { %v2066_v58 = vpop.eup %2065 }
 0x3e8   :  { %v1438_v59 = vmul.f32 %v2066_v58, %v1435_v57 }
 0x3ea   :  { %v1440_v7 = vmul.f32 %v1438_v59, %v1359_v50  ;;  %v1446_v61 = vrot.slane %v1438_v59, %v2552_v29 }
 0x3ec   :  { %v1441_v10 = vsub.f32 %v1439_v60, %v1440_v7  ;;  %v1448_v46 = vmul.f32 %v1446_v61, %v2767_v15  ;;  %v1449_v62 = vmul.f32 %v1446_v61, %v2765_v12  ;;  %v1462_v24 = vmul.f32 %v1446_v61, %v1273_v2 }
 0x3ed   :  { %v1463_v25 = vmul.f32 %v1446_v61, %v1274_v5 }
 0x3ee   :  { %v1454_v18 = vrot.slane %v1441_v10, %v2552_v29 }
 0x3f0   :  { %v1456_v30 = vadd.f32 %v1454_v18, %v1448_v46  ;;  %v1457_v31 = vadd.f32 %v1454_v18, %v1449_v62  ;;  %v1464_v32 = vadd.f32 %v1462_v24, %v1454_v18  ;;  %v1465_v33 = vadd.f32 %v1463_v25, %v1454_v18 }
 0x3f2   :  { %v1458_v63 = vmax.f32 %v1456_v30, 0.0  ;;  %v1459_v35 = vmax.f32 %v1457_v31, 0.0  ;;  %v1466_v37 = vmax.f32 %v1464_v32, 0.0  ;;  %v1467_v38 = vmax.f32 %v1465_v33, 0.0 }
 0x3f4   :  { %1460 = vst [vmem:[%s2805_s8] sm:$0xff] %v1458_v63  ;;  %1461 = vst [vmem:[%s2805_s8 + $0x8] sm:$0xff] %v1459_v35 }
 0x3f5   :  { %1532 = vst [vmem:[%s2805_s8 + $0x10] sm:$0xff] %v1466_v37  ;;  %1533 = vst [vmem:[%s2805_s8 + $0x18] sm:$0xff] %v1467_v38 }

</bundles_post_ra>
